<compile_context>
chip_gen: v6e
topology: v6e:2x2x1
jax: 0.10.0
libtpu: 0.0.40
codegen_flags: <defaults>
</compile_context>

<pallas_src>
import math

import jax
import jax.numpy as jnp
from jax.experimental import pallas as pl
from jax.experimental.pallas import tpu as pltpu


# ----------------------------- Pallas kernels ------------------------------ #

def _reconstruct_kernel_scale_u(u_ref, s_ref, vT_ref, o_ref):
    """o = (u * s) @ vT   with u:(TM,R), s:(1,R), vT:(R,TN), o:(TM,TN)."""
    # Scale in f32 on the VPU, cast back to the factor dtype for the MXU.
    us = (u_ref[...].astype(jnp.float32) * s_ref[...].astype(jnp.float32)
          ).astype(u_ref.dtype)
    o_ref[...] = jnp.dot(us, vT_ref[...],
                         preferred_element_type=jnp.float32).astype(o_ref.dtype)


def _reconstruct_kernel_scale_v(u_ref, s_ref, vT_ref, o_ref):
    """o = u @ (s * vT)   with u:(TM,R), s:(R,1), vT:(R,TN), o:(TM,TN)."""
    sv = (vT_ref[...].astype(jnp.float32) * s_ref[...].astype(jnp.float32)
          ).astype(vT_ref.dtype)
    o_ref[...] = jnp.dot(u_ref[...], sv,
                         preferred_element_type=jnp.float32).astype(o_ref.dtype)


# ------------------------------- wrapper ----------------------------------- #

def _floor_to(a, q):
    return max(q, (a // q) * q)


def _halve(t, q):
    """Halve t, keep it a multiple of q, floor at q."""
    return max(q, ((t // 2) // q) * q)


def pallas_reconstruct(u, s, v, *, out_dtype=None, tm_cap=1024, tn_cap=None,
                       min_grid_steps=4):
    """Pallas implementation of einsum('bir, br, bjr -> bij', u, s, v).

    u: (B, M, R), s: (B, R), v: (B, N, R).
    out_dtype: output storage dtype (default u.dtype).  Output bytes dominate
    HBM traffic, so bf16 output is ~2x wall-clock even with f32 factors.
    """
    B, M, R = u.shape
    _, N, _ = v.shape
    out_dtype = jnp.dtype(out_dtype) if out_dtype is not None else jnp.dtype(u.dtype)
    out_itemsize = out_dtype.itemsize

    # Pre-transpose v (cheap XLA transpose on a tiny (N,R) array) so the rhs
    # of the in-kernel matmul is lane-dense: (R, TN) with N on the lane axis.
    vT = jnp.swapaxes(v, -1, -2)                        # (B, R, N)

    # ------------------------- tile-size selection ------------------------- #
    tm_cap = _floor_to(int(tm_cap), 8)
    if tn_cap is None:
        # Target ~8 MiB output tile (2048 lanes for f32 output, 4096 for bf16).
        tn_cap = (8 << 20) // (tm_cap * out_itemsize)
    tn_cap = _floor_to(int(tn_cap), 128)

    # TM: multiple of 8 (<= M), or the full dim when M < 8.
    TM = min(tm_cap, _floor_to(M, 8)) if M >= 8 else M
    # TN: multiple of 128 (<= N, lane-dense stores), or the full dim when N < 128.
    TN = min(tn_cap, _floor_to(N, 128)) if N >= 128 else N

    # Min-grid-steps rule (keep both v7x TensorCores busy + a real pipeline):
    # shrink TN first, then TM, never past alignment floors.
    def _steps(tm, tn):
        return B * pl.cdiv(M, tm) * pl.cdiv(N, tn)

    while _steps(TM, TN) < min_grid_steps:
        if TN > 128 and TN % 128 == 0:
            TN = _halve(TN, 128)
        elif TM > 8 and TM % 8 == 0:
            TM = _halve(TM, 8)
        else:
            break

    grid = (B, pl.cdiv(M, TM), pl.cdiv(N, TN))

    # Fold the singular-value scale into the smaller per-tile operand.
    scale_v = TN <= TM
    if scale_v:
        s_arr = s.reshape(B, R, 1)
        s_spec = pl.BlockSpec((None, R, 1), lambda b, i, j: (b, 0, 0))
        kernel = _reconstruct_kernel_scale_v
    else:
        s_arr = s.reshape(B, 1, R)
        s_spec = pl.BlockSpec((None, 1, R), lambda b, i, j: (b, 0, 0))
        kernel = _reconstruct_kernel_scale_u

    # VMEM budget: double-buffered output + input tiles, generous slack,
    # capped at 48 MiB (v7x has only 64 MiB physical VMEM per TC).
    u_isz = jnp.dtype(u.dtype).itemsize
    v_isz = jnp.dtype(v.dtype).itemsize
    s_isz = jnp.dtype(s.dtype).itemsize
    vmem_est = 2 * (TM * TN * out_itemsize + TM * R * u_isz
                    + R * TN * v_isz + R * s_isz)
    vmem_limit = min(max(vmem_est + (8 << 20), 32 << 20), 48 << 20)

    cost = pl.CostEstimate(
        flops=2 * B * M * N * R,
        bytes_accessed=(B * M * N * out_itemsize + B * M * R * u_isz
                        + B * N * R * v_isz + B * R * s_isz),
        transcendentals=0,
    )

    return pl.pallas_call(
        kernel,
        out_shape=jax.ShapeDtypeStruct((B, M, N), out_dtype),
        grid_spec=pl.GridSpec(
            grid=grid,
            in_specs=[
                pl.BlockSpec((None, TM, R), lambda b, i, j: (b, i, 0)),
                s_spec,
                pl.BlockSpec((None, R, TN), lambda b, i, j: (b, 0, j)),
            ],
            out_specs=pl.BlockSpec((None, TM, TN), lambda b, i, j: (b, i, j)),
        ),
        compiler_params=pltpu.CompilerParams(
            # No reduction axis: every grid step writes a distinct output tile.
            dimension_semantics=("parallel", "parallel", "parallel"),
            vmem_limit_bytes=vmem_limit,
        ),
        cost_estimate=cost,
    )(u, s_arr, vT)


# ------------------------------ SVD module --------------------------------- #

class SVD:
    """JAX/Pallas port of the low-rank factorization forward pass."""

    def __init__(self, size, rank=None, compression=10, no_grad=False,
                 verbose=False):
        self.size = M, N = size
        self.no_grad = no_grad
        assert (rank, compression) != (None, None), \
            "'rank' or 'compression' must be specified."
        df_input = M * N
        df_lowrank = M + N
        if rank is None:
            self.rank = rank = max(math.ceil(df_input / (compression * df_lowrank)), 1)
        else:
            self.rank = rank
        self.compression = df_input / (rank * df_lowrank)
        self.verbose = verbose

    def decompose(self, x):
        # TODO(synk): torch.svd_lowrank (randomized Halko SVD) has no Pallas
        # equivalent; exact truncated SVD in plain JAX is used instead.
        u_full, s_full, vh_full = jnp.linalg.svd(x, full_matrices=False)
        R = self.rank
        u = u_full[..., :, :R]                            # (B, M, R)
        s = s_full[..., :R]                               # (B, R)
        v = jnp.swapaxes(vh_full, -1, -2)[..., :, :R]     # (B, N, R)
        return u, s, v

    def reconstruct(self, u, s, v, out_dtype=None):
        return pallas_reconstruct(u, s, v, out_dtype=out_dtype)

    def __call__(self, x):
        u, s, v = self.decompose(x)
        return self.reconstruct(u, s, v, out_dtype=x.dtype)


# --------------------------------- main ------------------------------------ #

if __name__ == "__main__":
    # 1) Full forward at the small demo shape.
    B, M, N = 2, 64, 128
    x = jax.random.normal(jax.random.PRNGKey(0), (B, M, N), dtype=jnp.float32)
    svd = SVD(size=(M, N), rank=8)
    out = jax.block_until_ready(svd(x))
    u, s, v = svd.decompose(x)
    ref = jnp.einsum("bir,br,bjr->bij", u, s, v)
    assert out.shape == (B, M, N)
    assert jnp.allclose(out, ref, atol=1e-4, rtol=1e-4), "mismatch (demo shape)"

    # 2) Ragged M and N (not multiples of 8 / 128) -> masked edge tiles,
    #    no input padding and no post-kernel output slice.
    k1, k2, k3 = jax.random.split(jax.random.PRNGKey(1), 3)
    u2 = jax.random.normal(k1, (1, 200, 8), jnp.float32)
    s2 = jax.random.uniform(k2, (1, 8), jnp.float32)
    v2 = jax.random.normal(k3, (1, 250, 8), jnp.float32)
    out2 = jax.block_until_ready(pallas_reconstruct(u2, s2, v2))
    ref2 = jnp.einsum("bir,br,bjr->bij", u2, s2, v2)
    assert out2.shape == (1, 200, 250)
    assert jnp.allclose(out2, ref2, atol=1e-4, rtol=1e-4), "mismatch (ragged)"

    # 3) Larger shape -> exercises the min-grid-steps tile shrink (>= 4 steps).
    k1, k2, k3 = jax.random.split(jax.random.PRNGKey(2), 3)
    u3 = jax.random.normal(k1, (1, 1024, 8), jnp.float32)
    s3 = jax.random.uniform(k2, (1, 8), jnp.float32)
    v3 = jax.random.normal(k3, (1, 2048, 8), jnp.float32)
    out3 = jax.block_until_ready(pallas_reconstruct(u3, s3, v3))
    ref3 = jnp.einsum("bir,br,bjr->bij", u3, s3, v3)
    assert jnp.allclose(out3, ref3, atol=1e-4, rtol=1e-4), "mismatch (tiled)"

    # 3b) bf16 factors + bf16 output (f32 MXU accumulation).
    out3b = jax.block_until_ready(
        pallas_reconstruct(u3.astype(jnp.bfloat16), s3.astype(jnp.bfloat16),
                           v3.astype(jnp.bfloat16)))
    ref3b = jnp.einsum("bir,br,bjr->bij",
                       u3.astype(jnp.bfloat16).astype(jnp.float32),
                       s3.astype(jnp.bfloat16).astype(jnp.float32),
                       v3.astype(jnp.bfloat16).astype(jnp.float32))
    assert out3b.dtype == jnp.bfloat16
    assert jnp.allclose(out3b.astype(jnp.float32), ref3b, atol=0.2, rtol=0.1), \
        "mismatch (bf16 factors)"

    # 3c) f32 factors, bf16 OUTPUT (decoupled out_dtype: halves the dominant
    #     HBM stream while keeping full-precision inputs / accumulation).
    out3c = jax.block_until_ready(
        pallas_reconstruct(u3, s3, v3, out_dtype=jnp.bfloat16))
    assert out3c.dtype == jnp.bfloat16
    assert jnp.allclose(out3c.astype(jnp.float32), ref3, atol=0.05, rtol=0.05), \
        "mismatch (bf16 output, f32 factors)"

    # 4) Tall-skinny shape where TN <= TM -> exercises the scale-into-v kernel.
    k1, k2, k3 = jax.random.split(jax.random.PRNGKey(3), 3)
    u4 = jax.random.normal(k1, (1, 512, 8), jnp.float32)
    s4 = jax.random.uniform(k2, (1, 8), jnp.float32)
    v4 = jax.random.normal(k3, (1, 128, 8), jnp.float32)
    out4 = jax.block_until_ready(pallas_reconstruct(u4, s4, v4))
    ref4 = jnp.einsum("bir,br,bjr->bij", u4, s4, v4)
    assert jnp.allclose(out4, ref4, atol=1e-4, rtol=1e-4), "mismatch (scale-v)"

    print("KERNEL_OK")
</pallas_src>

<mosaic_0001>
module attributes {stable_mosaic.version = 11 : i64} {
  func.func @_reconstruct_kernel_scale_u(%arg0: i32, %arg1: i32, %arg2: i32, %arg3: memref<1x32x8xf32, #tpu.memory_space<vmem>>, %arg4: memref<1x1x8xf32, #tpu.memory_space<vmem>>, %arg5: memref<1x8x128xf32, #tpu.memory_space<vmem>>, %arg6: memref<1x32x128xf32, #tpu.memory_space<vmem>>) attributes {dimension_semantics = [#tpu.dimension_semantics<parallel>, #tpu.dimension_semantics<parallel>, #tpu.dimension_semantics<parallel>], iteration_bounds = array<i64: 2, 2, 1>, scalar_prefetch = 0 : i64, scratch_operands = 0 : i64, tpu.core_type = #tpu.core_type<tc>, window_params = [{transform_indices = @transform_0, window_bounds = array<i64: 1, 32, 8>}, {transform_indices = @transform_1, window_bounds = array<i64: 1, 1, 8>}, {transform_indices = @transform_2, window_bounds = array<i64: 1, 8, 128>}, {transform_indices = @transform_3, window_bounds = array<i64: 1, 32, 128>}]} {
    %c0 = arith.constant 0 : index
    %c0_0 = arith.constant 0 : index
    %c0_1 = arith.constant 0 : index
    %0 = vector.load %arg3[%c0, %c0_0, %c0_1] : memref<1x32x8xf32, #tpu.memory_space<vmem>>, vector<1x32x8xf32>
    %1 = vector.shape_cast %0 : vector<1x32x8xf32> to vector<32x8xf32>
    %c0_2 = arith.constant 0 : index
    %c0_3 = arith.constant 0 : index
    %c0_4 = arith.constant 0 : index
    %2 = vector.load %arg4[%c0_2, %c0_3, %c0_4] : memref<1x1x8xf32, #tpu.memory_space<vmem>>, vector<1x1x8xf32>
    %3 = vector.shape_cast %2 : vector<1x1x8xf32> to vector<1x8xf32>
    %4 = vector.broadcast %3 : vector<1x8xf32> to vector<32x8xf32>
    %5 = arith.mulf %1, %4 : vector<32x8xf32>
    %c0_5 = arith.constant 0 : index
    %c0_6 = arith.constant 0 : index
    %c0_7 = arith.constant 0 : index
    %6 = vector.load %arg5[%c0_5, %c0_6, %c0_7] : memref<1x8x128xf32, #tpu.memory_space<vmem>>, vector<1x8x128xf32>
    %7 = vector.shape_cast %6 : vector<1x8x128xf32> to vector<8x128xf32>
    %cst = arith.constant dense<0.000000e+00> : vector<32x128xf32>
    %8 = tpu.matmul %5, %7, %cst {dimension_numbers = #tpu.dot_dimension_numbers<[1], [0], [0], [1], [0, 0, 1, 1], [], []>} : vector<32x8xf32>, vector<8x128xf32>, vector<32x128xf32> -> vector<32x128xf32>
    %c0_8 = arith.constant 0 : index
    %c0_9 = arith.constant 0 : index
    %c0_10 = arith.constant 0 : index
    %9 = vector.load %arg6[%c0_8, %c0_9, %c0_10] : memref<1x32x128xf32, #tpu.memory_space<vmem>>, vector<1x32x128xf32>
    %10 = vector.shape_cast %9 : vector<1x32x128xf32> to vector<32x128xf32>
    %11 = vector.shape_cast %8 : vector<32x128xf32> to vector<1x32x128xf32>
    tpu.vector_store %arg6[%c0_8, %c0_9, %c0_10], %11 {strides = array<i32>} : memref<1x32x128xf32, #tpu.memory_space<vmem>>, vector<1x32x128xf32>,
    return
  }
  func.func @transform_0(%arg0: i32, %arg1: i32, %arg2: i32) -> (i32, i32, i32) {
    %c0_i32 = arith.constant 0 : i32
    %c0_i32_0 = arith.constant 0 : i32
    return %arg0, %arg1, %c0_i32 : i32, i32, i32
  }
  func.func @transform_1(%arg0: i32, %arg1: i32, %arg2: i32) -> (i32, i32, i32) {
    %c0_i32 = arith.constant 0 : i32
    %c0_i32_0 = arith.constant 0 : i32
    %c0_i32_1 = arith.constant 0 : i32
    return %arg0, %c0_i32, %c0_i32_0 : i32, i32, i32
  }
  func.func @transform_2(%arg0: i32, %arg1: i32, %arg2: i32) -> (i32, i32, i32) {
    %c0_i32 = arith.constant 0 : i32
    %c0_i32_0 = arith.constant 0 : i32
    return %arg0, %c0_i32, %arg2 : i32, i32, i32
  }
  func.func @transform_3(%arg0: i32, %arg1: i32, %arg2: i32) -> (i32, i32, i32) {
    %c0_i32 = arith.constant 0 : i32
    return %arg0, %arg1, %arg2 : i32, i32, i32
  }
}

</mosaic_0001>

<bundles_post_ra>
// kernel: tpu_custom_call.1
= control target key start
LH: loop header
LB: loop body
LE: loop exit
PB: predicated region body
PF: predicated region fallthrough
CT: control target
= control target key end

     0   :  { %8 = vsyncpa [#allocation3], 0  ;;  %s870_s0 = inlined_call_operand.vmem [shape: f32[2,64,8], index: 0, kind: input, shape index: {}]   ;;  %s871_s1 = inlined_call_operand.vmem [shape: f32[2,1,8], index: 1, kind: input, shape index: {}]   ;;  %s872_s2 = inlined_call_operand.vmem [shape: f32[2,8,128], index: 2, kind: input, shape index: {}]   ;;  %s873_s3 = inlined_call_operand.hbm [shape: f32[2,64,128], index: 3, kind: output, shape index: {}]  }
   0x1   :  { %10 = vsyncpa [#allocation3 + $0x1], 0  ;;  %s722_s12 = smov 0   ;;  %s724_s13 = smov 0  }
   0x2   :  { %s726_s14 = smov 0   ;;  %s728_s15 = smov 0  }
   0x3   :  { %s730_s16 = smov 0   ;;  %s732_s17 = smov 0  }
   0x4   :  { %s734_s18 = smov 0   ;;  %s736_s19 = smov 0  }
   0x5 LB: > { %s496_s20 = sadd.s32 4294967295, %s697_s19   ;;  %s497_s21 = sadd.s32 4294967294, %s697_s19   ;;  %s697_s19 = sphi %s736_s19, %s16_s19   ;;  %s693_s18 = sphi %s734_s18, %s882_s18   ;;  %s689_s17 = sphi %s732_s17, %s881_s17   ;;  %s685_s16 = sphi %s730_s16, %s880_s16   ;;  %s681_s15 = sphi %s728_s15, %s879_s15   ;;  %s677_s14 = sphi %s726_s14, %s878_s14   ;;  %s673_s13 = sphi %s724_s13, %s877_s13   ;;  %s669_s12 = sphi %s722_s12, %s876_s12  }
   0x6   : > { %s31_s22 = sadd.s32 1, %s689_s17  ;;  %s35_s23 = sadd.s32 1, %s693_s18 }
   0x7   : > { %p33_p0 = scmp.ge.s32.totalorder %s31_s22, 2  ;;  %p138_p1 = scmp.ne.s32.totalorder %s677_s14, %s673_s13 }
   0x8   : > { %p139_p2 = scmp.eq.s32.totalorder %s496_s20, 3  ;;  %p144_p5 = scmp.ne.s32.totalorder %s673_s13, %s669_s12 }
   0x9   : > { %s884_s22 = smov (%p33_p0, %s31_s22), 0  ;;  %s886_s23 = smov (!%p33_p0, %s35_s23), %s693_s18 }
   0xa   : > { %s122_s24 = ssub.s32 %s689_s17, %s884_s22  ;;  %p773_p3 = por %p139_p2, %p138_p1 }
   0xb   : > { %p37_p4 = scmp.ge.s32.totalorder %s886_s23, 2  ;;  %p145_p6 = scmp.eq.s32.totalorder %s497_s21, 3 }
   0xc   : > { %p500_p7 = scmp.ge.s32.totalorder %s697_s19, 1  ;;  %p192_p9 = scmp.lt.s32.totalorder %s697_s19, 5 }
   0xd   : > { %s888_s23 = smov (%p37_p4, %s886_s23), 0  ;;  %p782_p8 = por %p145_p6, %p144_p5 }
   0xe   : > { %s121_s27 = ssub.s32 %s693_s18, %s888_s23  ;;  %s128_s28 = sadd.s32 1, %s677_s14 }
   0xf   : > { %s123_s29 = sor.u32 %s122_s24, %s121_s27  ;;  %p193_p10 = pnand %p500_p7, %p192_p9 }
  0x10   : > { %p126_p11 = scmp.eq.s32.totalorder %s123_s29, 0  ;;  %s794_s4 = sshll.u32 (!%p193_p10), %s681_s15, 2 }
  0x11   : > { %196 = sbr.rel (%p193_p10) target bundleno = 241 (0xf1), region = 32  ;;  %p231_p12 = scmp.lt.s32.totalorder (!%p193_p10), %s685_s16, 1 }
  0x12   : > { %s791_s30 = scalar_select %p126_p11, %s677_s14, %s128_s28  }
  0x13   : > { %p233_p13 = scmp.lt.s32.totalorder (!%p193_p10), %s794_s4, 7 }
  0x16   : > { %s232_s5 = scalar_select %p231_p12, %s685_s16, 1  ;;  %vm267_vm0 = vcmask 64512  }
  0x17   : > { %s234_s6 = scalar_select %p233_p13, %s794_s4, 7 }
  0x18   : > { %s503_s7 = sshll.u32 %s232_s5, 3  ;;  %s242_s29 = scalar_lea.vmem %s871_s1, %s232_s5 }
  0x19   : > { %s236_s8 = sadd.s32 %s503_s7, %s234_s6  ;;  %s249_s11 = scalar_lea.vmem %s872_s2, %s503_s7  ;;  %v506_v4 = vld [vmem:[%s242_s29] ss:$0 sm:$0xff] }
  0x1a   : > { %s504_s20 = sshll.u32 %s236_s8, 3  ;;  %v266_v0 = vld [vmem:[%s249_s11] sm:$0xff]  ;;  %s227_s6 = sand.u32 1, %s673_s13  }
  0x1b   : > { %s238_s27 = scalar_lea.vmem %s870_s0, %s504_s20  ;;  %522 = vmatprep.subr.mxu0 %v266_v0  ;;  %530 = vmatprep.subr.mxu1 %v266_v0  ;;  %s513_s7 = sshll.u32 %s685_s16, 3 }
  0x1c   : > { %523 = vmatpush3.msra.mxu0 %v266_v0  ;;  %531 = vmatpush3.msra.mxu1 %v266_v0  ;;  %v251_v1 = vld [vmem:[%s238_s27] sm:$0xff]  ;;  %v253_v2 = vld [vmem:[%s238_s27 + $0x10] sm:$0xff]  ;;  %v252_v3 = vld [vmem:[%s238_s27 + $0x8] sm:$0xff]  ;;  %s501_s8 = sshll.u32 %s227_s6, 5  ;;  %s383_s5 = sadd.s32 %s513_s7, %s794_s4 }
  0x1d   : > { %v254_v5 = vld [vmem:[%s238_s27 + $0x18] sm:$0xff]  ;;  %v262_v6 = vmul.f32 %v506_v4, %v251_v1  ;;  %v264_v7 = vmul.f32 %v506_v4, %v253_v2  ;;  %v263_v8 = vmul.f32 %v506_v4, %v252_v3  ;;  %s514_s9 = sshll.u32 %s383_s5, 7  ;;  %s229_s10 = scalar_lea.vmem [#allocation2], %s501_s8 }
  0x1e   : > { %v265_v9 = vmul.f32 %v506_v4, %v254_v5  ;;  %s386_s11 = sshll.u32 %s229_s10, 4  ;;  %s815_s24 = scalar_lea.hbm %s873_s3, %s514_s9  ;;  %s817_s11 = int_to_ptr.vmem [resolvable:$true] %s386_s11 }
  0x1f   : > { %524 = vmatprep.mubr.msk.f32.mxu0 %vm267_vm0, %v262_v6  ;;  %527 = vmatprep.mubr.msk.f32.mxu1 %vm267_vm0, %v264_v7  ;;  %s819_s16 = scalar_lea.sflag [#allocation3], %s227_s6  ;;  %s605_s4 = scalar_lea.vmem %s817_s11, 512 }
  0x20   : > { %525 = vmatmul.mubr.msk.f32.vlgmr.msra.gmra.mxu0 %vm267_vm0, %v263_v8  ;;  %528 = vmatmul.mubr.msk.f32.vlgmr.msra.gmra.mxu1 %vm267_vm0, %v265_v9  ;;  %p606_p0 = scmp.ne.s32.totalorder %s817_s11, %s605_s4  ;;  %s699_s27 = smov [#allocation2]  }
  0x21   : > { %s609_s15 = sshll.u32 %s699_s27, 4  ;;  %s610_s15 = int_to_ptr.vmem [resolvable:$false] %s609_s15 }
  0x22   : > { %p607_p1 = pnand %p606_p0, %p773_p3  ;;  %s611_s28 = scalar_lea.vmem %s610_s15, 1024 }
  0x23   : > { %p612_p4 = scmp.lt.s32.totalorder %s817_s11, %s610_s15  ;;  %p613_p5 = scmp.lt.s32.totalorder %s611_s28, %s605_s4 }
  0x24   : > { %p608_p2 = pneg %p607_p1 }
  0x25   : > { %p614_p6 = por %p613_p5, %p612_p4 }
  0x27   : > { %p615_p7 = pnand %p614_p6, %p608_p2 }
  0xe0   : > { %v526_v10 = vpop.f32.mrf.mxu0  ;;  %v529_v11 = vpop.f32.mrf.mxu1 }
  0xe1   : > { %366 = vst [vmem:[%s229_s10 + $0x8] sm:$0xff] %v526_v10  ;;  %368 = vst [vmem:[%s229_s10 + $0x18] sm:$0xff] %v529_v11 }
  0xe2   : > { %v346_v12 = vpop.f32.mrf.mxu0  ;;  %v356_v13 = vpop.f32.mrf.mxu1 }
  0xe3   : > { %365 = vst [vmem:[%s229_s10] sm:$0xff] %v346_v12  ;;  %367 = vst [vmem:[%s229_s10 + $0x10] sm:$0xff] %v356_v13 }
  0xe4   : > { %618 = shalt.err (!%p615_p7)
}
  0xe5   : > { %s619_s29 = scalar_lea.hbm %s815_s24, 512  ;;  %s623_s8 = scalar_lea.hbm %s873_s3, 2048 }
  0xe6   : > { %p620_p9 = scmp.ne.s32.totalorder %s815_s24, %s619_s29  ;;  %p624_p12 = scmp.lt.s32.totalorder %s815_s24, %s873_s3 }
  0xe7   : > { %p625_p13 = scmp.lt.s32.totalorder %s623_s8, %s619_s29 }
  0xe8   : > { %p621_p10 = pnand %p620_p9, %p773_p3 }
  0xe9   : > { %p626_p0 = por %p625_p13, %p624_p12 }
  0xea   : > { %p622_p11 = pneg %p621_p10 }
  0xec   : > { %p627_p1 = pnand %p626_p0, %p622_p11 }
  0xee   : > { %630 = shalt.err (!%p627_p1)
}
  0xef   : > { %s700_s10 = smov 128   ;;  %s701_s20 = smov 8  }
  0xf0   : > { %532 = dma.vmem_to_hbm [thread:$0]  (%p773_p3), %s817_s11, 512, %s815_s24, %s819_s16, %s700_s10, %s700_s10, %s701_s20  }
  0xf1 PF: > { %p538_p2 = scmp.ge.s32.totalorder %s697_s19, 2  ;;  %s401_s21 = sand.u32 1, %s669_s12  }
  0xf2   : > { %s402_s4 = scalar_lea.sflag [#allocation3], %s401_s21 }
  0xf3   : > { %p535_p4 = pnand %p538_p2, %p782_p8 }
  0xf5   : > { %p536_p5 = pneg %p535_p4 }
  0xf7   : > { %664 = dma.done.wait (%p536_p5), %s402_s4, 512  }
  0xf8   : > { %666 = vsyncadd (%p536_p5), %s402_s4, 4294966784  ;;  %s16_s19 = sadd.s32 1, %s697_s19   ;;  %s876_s12 = smov %s673_s13 }
  0xf9   : > { %p13_p6 = scmp.ge.s32.totalorder %s16_s19, 6   ;;  %s877_s13 = smov %s677_s14 }
  0xfa   : > { %s878_s14 = smov %s791_s30  ;;  %s879_s15 = smov %s689_s17 }
  0xfb   : > { %s880_s16 = smov %s693_s18  ;;  %s881_s17 = smov %s884_s22 }
  0xfc   : > { %s882_s18 = smov %s888_s23  ;;  %15 = sbr.rel (!%p13_p6) target bundleno = 5 (0x5), region = 73 }
 0x101   :  { %407 = vsyncpa [#allocation3], 1 }
 0x102   :  { %409 = vsyncpa [#allocation3 + $0x1], 1 }

</bundles_post_ra>
